<compile_context>
chip_gen: v5e
topology: v5e:2x2
jax: 0.10.0
libtpu: 0.0.40
codegen_flags: <defaults>
</compile_context>

<pallas_src>
import math
import jax
import jax.numpy as jnp
import numpy as np
from jax import lax
from jax.experimental import pallas as pl
from jax.experimental.pallas import tpu as pltpu

VOCAB = 100
D_MODEL = 32
MAX_SEQ = 9            # input token length L = MAX_SEQ - 1 = 8; S (with CLS) = 9
N_LAYERS = 2
N_HEADS = 4
EMB_IMG = 16
FF_DIM = 64
LN_EPS = 1e-5
HEAD_DIM = D_MODEL // N_HEADS
BT_CAP = 64            # max CLS rows per grid step (bounds O(bt^2) intermediates)


def _aligned_offsets(row_counts):
    """Row offsets for packing tensors into one slab, each start 8-aligned."""
    offs, r = [], 0
    for n in row_counts:
        offs.append(r)
        r += ((n + 7) // 8) * 8
    return offs, r


# ---- packed weight slab layout (static, derived from the module dims) -----
(_OFF_WQ, _OFF_WO, _OFF_W2, _OFF_BQ, _OFF_BO, _OFF_B2,
 _OFF_LN1G, _OFF_LN1B, _OFF_LN2G, _OFF_LN2B), _R32 = _aligned_offsets(
    [D_MODEL, D_MODEL, FF_DIM, 1, 1, 1, 1, 1, 1, 1])
(_OFF_WKV, _OFF_W1, _OFF_BKV, _OFF_B1), _R64 = _aligned_offsets(
    [D_MODEL, D_MODEL, 1, 1])


def _layernorm(x, g, b):
    """LayerNorm with rsqrt (EUP) instead of div+sqrt (VALU)."""
    mu = jnp.mean(x, axis=-1, keepdims=True)
    xc = x - mu
    var = jnp.mean(xc * xc, axis=-1, keepdims=True)
    return xc * lax.rsqrt(var + LN_EPS) * g + b


def text_encoder_kernel(cls_ref, emb_ref, w32_ref, w64_ref, proj_ref, out_ref):
    """One encoder layer (CLS rows only downstream of K/V) + projection + L2 norm.

    cls_ref : (bt, D)     pre-gathered CLS rows (one per batch element).
    emb_ref : (bt*S, D)   bt batch elements folded into the rows.
    w32_ref : (R32, D)    packed wq | wo | w2 | biases/LN params (width D).
    w64_ref : (R64, 2D)   packed wkv | w1 | their biases (width 2D).
    proj_ref: (D, E)      projection to the image-embedding space.
    """
    bt = out_ref.shape[0]
    seq = emb_ref.shape[0] // bt
    d = D_MODEL
    hd = HEAD_DIM

    x_cls = cls_ref[...]                                 # (bt, D)
    x_flat = emb_ref[...]                                # (bt*S, D)

    # Static slices of the packed weight slabs (free views, no extra DMAs).
    wq   = w32_ref[_OFF_WQ:_OFF_WQ + d, :]
    wo   = w32_ref[_OFF_WO:_OFF_WO + d, :]
    w2   = w32_ref[_OFF_W2:_OFF_W2 + FF_DIM, :]
    bq   = w32_ref[_OFF_BQ:_OFF_BQ + 1, :]
    bo   = w32_ref[_OFF_BO:_OFF_BO + 1, :]
    b2   = w32_ref[_OFF_B2:_OFF_B2 + 1, :]
    ln1g = w32_ref[_OFF_LN1G:_OFF_LN1G + 1, :]
    ln1b = w32_ref[_OFF_LN1B:_OFF_LN1B + 1, :]
    ln2g = w32_ref[_OFF_LN2G:_OFF_LN2G + 1, :]
    ln2b = w32_ref[_OFF_LN2B:_OFF_LN2B + 1, :]
    wkv  = w64_ref[_OFF_WKV:_OFF_WKV + d, :]
    w1   = w64_ref[_OFF_W1:_OFF_W1 + d, :]
    bkv  = w64_ref[_OFF_BKV:_OFF_BKV + 1, :]
    b1   = w64_ref[_OFF_B1:_OFF_B1 + 1, :]

    # Q only for CLS rows; fused K|V projection over the whole slab.
    q_cls = jnp.dot(x_cls, wq, preferred_element_type=jnp.float32) + bq   # (bt, D)
    kv = jnp.dot(x_flat, wkv, preferred_element_type=jnp.float32) + bkv   # (bt*S, 2D)

    # Block-diagonal attention bias: the CLS query of batch b may only attend
    # to rows [b*seq, (b+1)*seq) of the slab.
    row = lax.broadcasted_iota(jnp.int32, (bt, bt * seq), 0)
    col = lax.broadcasted_iota(jnp.int32, (bt, bt * seq), 1)
    lo = row * seq
    bias = jnp.where((col >= lo) & (col < lo + seq), 0.0, -1e30).astype(jnp.float32)

    # One hoisted transpose of the K half (and V half, unused) of the fused
    # projection, instead of a per-head contraction on the last dim.
    kvT = jnp.transpose(kv)                              # (2D, bt*S)
    scale = 1.0 / math.sqrt(hd)
    attn = jnp.zeros((bt, d), jnp.float32)
    for h in range(N_HEADS):                             # static unroll over heads
        sl = slice(h * hd, (h + 1) * hd)
        qh = q_cls[:, sl]                                # (bt, hd)
        kTh = kvT[sl, :]                                 # (hd, bt*S)
        vh = kv[:, d + h * hd: d + (h + 1) * hd]         # (bt*S, hd)

        s = jnp.dot(qh, kTh, preferred_element_type=jnp.float32) * scale + bias
        # No per-row max subtraction: scores are O(1) here and the -1e30
        # masked columns underflow to exactly 0 in the exp.
        p = jnp.exp(s)                                   # (bt, bt*S)
        denom = jnp.sum(p, axis=-1, keepdims=True)       # (bt, 1)
        ctx = jnp.dot(p, vh, preferred_element_type=jnp.float32)         # (bt, hd)
        # Normalize AFTER p@v: bt*hd multiplies instead of bt*bt*S.
        ctx = ctx * pl.reciprocal(denom, approx=False)
        # Fold the head concatenation into the output projection.
        attn = attn + jnp.dot(ctx, wo[sl, :], preferred_element_type=jnp.float32)
    attn = attn + bo

    # Residual + LN, FFN (ReLU), residual + LN -- CLS rows only.
    x1 = _layernorm(x_cls + attn, ln1g, ln1b)
    ff = jnp.maximum(
        jnp.dot(x1, w1, preferred_element_type=jnp.float32) + b1, 0.0)
    ff = jnp.dot(ff, w2, preferred_element_type=jnp.float32) + b2
    x2 = _layernorm(x1 + ff, ln2g, ln2b)

    # Projection to image-embedding space + L2 normalize (rsqrt on the EUP).
    e = jnp.dot(x2, proj_ref[...], preferred_element_type=jnp.float32)    # (bt, E)
    e = e * lax.rsqrt(jnp.sum(e * e, axis=-1, keepdims=True) + 1e-12)
    out_ref[...] = e                                     # one lane/sublane-dense store


def _pack_weight_slabs(layer, projection):
    """Pack the 15 per-layer tensors into 3 f32 slabs (DMA consolidation)."""
    w32 = jnp.zeros((_R32, D_MODEL), jnp.float32)
    w32 = w32.at[_OFF_WQ:_OFF_WQ + D_MODEL].set(layer["wq"])
    w32 = w32.at[_OFF_WO:_OFF_WO + D_MODEL].set(layer["wo"])
    w32 = w32.at[_OFF_W2:_OFF_W2 + FF_DIM].set(layer["w2"])
    w32 = w32.at[_OFF_BQ:_OFF_BQ + 1].set(layer["bq"])
    w32 = w32.at[_OFF_BO:_OFF_BO + 1].set(layer["bo"])
    w32 = w32.at[_OFF_B2:_OFF_B2 + 1].set(layer["b2"])
    w32 = w32.at[_OFF_LN1G:_OFF_LN1G + 1].set(layer["ln1g"])
    w32 = w32.at[_OFF_LN1B:_OFF_LN1B + 1].set(layer["ln1b"])
    w32 = w32.at[_OFF_LN2G:_OFF_LN2G + 1].set(layer["ln2g"])
    w32 = w32.at[_OFF_LN2B:_OFF_LN2B + 1].set(layer["ln2b"])

    w64 = jnp.zeros((_R64, 2 * D_MODEL), jnp.float32)
    w64 = w64.at[_OFF_WKV:_OFF_WKV + D_MODEL].set(
        jnp.concatenate([layer["wk"], layer["wv"]], axis=1))
    w64 = w64.at[_OFF_W1:_OFF_W1 + D_MODEL].set(layer["w1"])
    w64 = w64.at[_OFF_BKV:_OFF_BKV + 1].set(
        jnp.concatenate([layer["bk"], layer["bv"]], axis=1))
    w64 = w64.at[_OFF_B1:_OFF_B1 + 1].set(layer["b1"])

    return w32, w64, projection.astype(jnp.float32)


def text_encoder_forward(x_ids, params):
    B, L = x_ids.shape
    # Glue (embedding gather + positional add + CLS concat) stays in plain JAX.
    tok = params["tok_emb"][x_ids]                                       # (B, L, D)
    emb = tok + params["pos_emb"][:L][None]
    cls = jnp.broadcast_to(params["cls_token"], (B, 1, D_MODEL))
    emb = jnp.concatenate([cls, emb], axis=1).astype(jnp.float32)        # (B, S, D)
    S = emb.shape[1]

    # Only the last layer's output is kept by the PyTorch loop (see header note).
    w32, w64, proj = _pack_weight_slabs(params["layers"][-1], params["projection"])

    # Slab sizing: pad batch to a multiple of 8 (sublane-aligned loads,
    # unmasked output store); cap rows per grid step at BT_CAP so the O(bt^2)
    # block-diagonal score/bias intermediates stay tiny on every generation
    # (at bt=64 peak live intermediates are <1 MiB, well under v7x's 64 MiB
    # VMEM).  Force >=2 "parallel" slabs only on 2-TensorCore chips (v7x).
    Bp8 = ((B + 7) // 8) * 8
    try:
        two_tc = "v7" in jax.devices()[0].device_kind.lower()
    except Exception:  # pragma: no cover - device query is best-effort
        two_tc = False
    n_slabs = max(1, (Bp8 + BT_CAP - 1) // BT_CAP)
    if two_tc and Bp8 > 8 and n_slabs < 2:
        n_slabs = 2
    bt = (((Bp8 + n_slabs - 1) // n_slabs) + 7) // 8 * 8
    Bp = n_slabs * bt
    if Bp != B:
        emb = jnp.concatenate(
            [emb, jnp.zeros((Bp - B, S, D_MODEL), emb.dtype)], axis=0)

    cls_rows = emb[:, 0, :]                              # (Bp, D) CLS gather in wrapper
    emb_flat = emb.reshape(Bp * S, D_MODEL)              # free row-major reshape

    out = pl.pallas_call(
        text_encoder_kernel,
        out_shape=jax.ShapeDtypeStruct((Bp, EMB_IMG), jnp.float32),
        grid=(n_slabs,),
        in_specs=[
            pl.BlockSpec((bt, D_MODEL), lambda i: (i, 0)),          # CLS rows
            pl.BlockSpec((bt * S, D_MODEL), lambda i: (i, 0)),      # full slab
            pl.BlockSpec((_R32, D_MODEL), lambda i: (0, 0)),        # packed weights
            pl.BlockSpec((_R64, 2 * D_MODEL), lambda i: (0, 0)),
            pl.BlockSpec((D_MODEL, EMB_IMG), lambda i: (0, 0)),
        ],
        out_specs=pl.BlockSpec((bt, EMB_IMG), lambda i: (i, 0)),
        compiler_params=pltpu.CompilerParams(dimension_semantics=("parallel",)),
    )(cls_rows, emb_flat, w32, w64, proj)
    return out[:B]                                       # (B, E)


def _ref_layernorm(x, g, b):
    mu = jnp.mean(x, axis=-1, keepdims=True)
    var = jnp.mean((x - mu) ** 2, axis=-1, keepdims=True)
    return (x - mu) / jnp.sqrt(var + LN_EPS) * g + b


def ref_forward(x_ids, params):
    """Pure-JAX reference for correctness checking (standard formulation)."""
    B, L = x_ids.shape
    emb = params["tok_emb"][x_ids] + params["pos_emb"][:L][None]
    cls = jnp.broadcast_to(params["cls_token"], (B, 1, D_MODEL))
    x = jnp.concatenate([cls, emb], axis=1)
    layer = params["layers"][-1]
    q = x @ layer["wq"] + layer["bq"]
    k = x @ layer["wk"] + layer["bk"]
    v = x @ layer["wv"] + layer["bv"]
    hd = D_MODEL // N_HEADS

    def split(t):
        return t.reshape(B, -1, N_HEADS, hd).transpose(0, 2, 1, 3)

    s = jnp.einsum("bhqd,bhkd->bhqk", split(q), split(k)) / math.sqrt(hd)
    p = jax.nn.softmax(s, axis=-1)
    attn = jnp.einsum("bhqk,bhkd->bhqd", p, split(v))
    attn = attn.transpose(0, 2, 1, 3).reshape(B, -1, D_MODEL)
    attn = attn @ layer["wo"] + layer["bo"]
    x1 = _ref_layernorm(x + attn, layer["ln1g"], layer["ln1b"])
    ff = jnp.maximum(x1 @ layer["w1"] + layer["b1"], 0.0)
    ff = ff @ layer["w2"] + layer["b2"]
    x2 = _ref_layernorm(x1 + ff, layer["ln2g"], layer["ln2b"])
    e = x2[:, 0, :] @ params["projection"]
    return e / jnp.linalg.norm(e, axis=-1, keepdims=True)


def init_params(key):
    keys = iter(jax.random.split(key, 8 + 12 * N_LAYERS))

    def nrm(shape, scale=0.05):
        return scale * jax.random.normal(next(keys), shape, dtype=jnp.float32)

    params = {
        "tok_emb": nrm((VOCAB, D_MODEL), 1.0),
        "pos_emb": nrm((MAX_SEQ, D_MODEL), 1.0),
        "cls_token": nrm((1, 1, D_MODEL), 1.0),          # nn.Parameter randn
        "projection": nrm((D_MODEL, EMB_IMG), 1.0),      # nn.Parameter randn
        "layers": [],
    }
    for _ in range(N_LAYERS):
        params["layers"].append({
            "wq": nrm((D_MODEL, D_MODEL)), "wk": nrm((D_MODEL, D_MODEL)),
            "wv": nrm((D_MODEL, D_MODEL)), "wo": nrm((D_MODEL, D_MODEL)),
            "bq": nrm((1, D_MODEL)), "bk": nrm((1, D_MODEL)),
            "bv": nrm((1, D_MODEL)), "bo": nrm((1, D_MODEL)),
            "ln1g": jnp.ones((1, D_MODEL), jnp.float32),
            "ln1b": jnp.zeros((1, D_MODEL), jnp.float32),
            "w1": nrm((D_MODEL, FF_DIM)), "b1": nrm((1, FF_DIM)),
            "w2": nrm((FF_DIM, D_MODEL)), "b2": nrm((1, D_MODEL)),
            "ln2g": jnp.ones((1, D_MODEL), jnp.float32),
            "ln2b": jnp.zeros((1, D_MODEL), jnp.float32),
        })
    return params


if __name__ == "__main__":
    key = jax.random.PRNGKey(0)
    pkey, xkey = jax.random.split(key)
    params = init_params(pkey)
    x_ids = jax.random.randint(xkey, (2, MAX_SEQ - 1), 0, VOCAB, dtype=jnp.int32)

    out = jax.block_until_ready(text_encoder_forward(x_ids, params))

    ref = ref_forward(x_ids, params)
    np.testing.assert_allclose(np.asarray(out), np.asarray(ref), rtol=1e-4, atol=1e-4)
    print("KERNEL_OK")
</pallas_src>

<mosaic_0001>
module attributes {stable_mosaic.version = 11 : i64} {
  func.func @text_encoder_kernel(%arg0: i32, %arg1: memref<8x32xf32, #tpu.memory_space<vmem>>, %arg2: memref<72x32xf32, #tpu.memory_space<vmem>>, %arg3: memref<184x32xf32, #tpu.memory_space<vmem>>, %arg4: memref<80x64xf32, #tpu.memory_space<vmem>>, %arg5: memref<32x16xf32, #tpu.memory_space<vmem>>, %arg6: memref<8x16xf32, #tpu.memory_space<vmem>>) attributes {dimension_semantics = [#tpu.dimension_semantics<parallel>], iteration_bounds = array<i64: 1>, scalar_prefetch = 0 : i64, scratch_operands = 0 : i64, tpu.core_type = #tpu.core_type<tc>, window_params = [{transform_indices = @transform_0, window_bounds = array<i64: 8, 32>}, {transform_indices = @transform_1, window_bounds = array<i64: 72, 32>}, {pipeline_mode = #tpu.pipeline_mode<synchronous>, transform_indices = @transform_2, window_bounds = array<i64: 184, 32>}, {pipeline_mode = #tpu.pipeline_mode<synchronous>, transform_indices = @transform_3, window_bounds = array<i64: 80, 64>}, {pipeline_mode = #tpu.pipeline_mode<synchronous>, transform_indices = @transform_4, window_bounds = array<i64: 32, 16>}, {transform_indices = @transform_5, window_bounds = array<i64: 8, 16>}]} {
    %c0 = arith.constant 0 : index
    %c0_0 = arith.constant 0 : index
    %0 = vector.load %arg1[%c0, %c0_0] : memref<8x32xf32, #tpu.memory_space<vmem>>, vector<8x32xf32>
    %c0_1 = arith.constant 0 : index
    %c0_2 = arith.constant 0 : index
    %1 = vector.load %arg2[%c0_1, %c0_2] : memref<72x32xf32, #tpu.memory_space<vmem>>, vector<72x32xf32>
    %c0_3 = arith.constant 0 : index
    %c0_4 = arith.constant 0 : index
    %2 = vector.load %arg3[%c0_3, %c0_4] : memref<184x32xf32, #tpu.memory_space<vmem>>, vector<32x32xf32>
    %c32 = arith.constant 32 : index
    %c0_5 = arith.constant 0 : index
    %3 = vector.load %arg3[%c32, %c0_5] : memref<184x32xf32, #tpu.memory_space<vmem>>, vector<32x32xf32>
    %c64 = arith.constant 64 : index
    %c0_6 = arith.constant 0 : index
    %4 = vector.load %arg3[%c64, %c0_6] : memref<184x32xf32, #tpu.memory_space<vmem>>, vector<64x32xf32>
    %c128 = arith.constant 128 : index
    %c0_7 = arith.constant 0 : index
    %5 = vector.load %arg3[%c128, %c0_7] : memref<184x32xf32, #tpu.memory_space<vmem>>, vector<1x32xf32>
    %c136 = arith.constant 136 : index
    %c0_8 = arith.constant 0 : index
    %6 = vector.load %arg3[%c136, %c0_8] : memref<184x32xf32, #tpu.memory_space<vmem>>, vector<1x32xf32>
    %c144 = arith.constant 144 : index
    %c0_9 = arith.constant 0 : index
    %7 = vector.load %arg3[%c144, %c0_9] : memref<184x32xf32, #tpu.memory_space<vmem>>, vector<1x32xf32>
    %c152 = arith.constant 152 : index
    %c0_10 = arith.constant 0 : index
    %8 = vector.load %arg3[%c152, %c0_10] : memref<184x32xf32, #tpu.memory_space<vmem>>, vector<1x32xf32>
    %c160 = arith.constant 160 : index
    %c0_11 = arith.constant 0 : index
    %9 = vector.load %arg3[%c160, %c0_11] : memref<184x32xf32, #tpu.memory_space<vmem>>, vector<1x32xf32>
    %c168 = arith.constant 168 : index
    %c0_12 = arith.constant 0 : index
    %10 = vector.load %arg3[%c168, %c0_12] : memref<184x32xf32, #tpu.memory_space<vmem>>, vector<1x32xf32>
    %c176 = arith.constant 176 : index
    %c0_13 = arith.constant 0 : index
    %11 = vector.load %arg3[%c176, %c0_13] : memref<184x32xf32, #tpu.memory_space<vmem>>, vector<1x32xf32>
    %c0_14 = arith.constant 0 : index
    %c0_15 = arith.constant 0 : index
    %12 = vector.load %arg4[%c0_14, %c0_15] : memref<80x64xf32, #tpu.memory_space<vmem>>, vector<32x64xf32>
    %c32_16 = arith.constant 32 : index
    %c0_17 = arith.constant 0 : index
    %13 = vector.load %arg4[%c32_16, %c0_17] : memref<80x64xf32, #tpu.memory_space<vmem>>, vector<32x64xf32>
    %c64_18 = arith.constant 64 : index
    %c0_19 = arith.constant 0 : index
    %14 = vector.load %arg4[%c64_18, %c0_19] : memref<80x64xf32, #tpu.memory_space<vmem>>, vector<1x64xf32>
    %c72 = arith.constant 72 : index
    %c0_20 = arith.constant 0 : index
    %15 = vector.load %arg4[%c72, %c0_20] : memref<80x64xf32, #tpu.memory_space<vmem>>, vector<1x64xf32>
    %cst = arith.constant dense<0.000000e+00> : vector<8x32xf32>
    %16 = tpu.matmul %0, %2, %cst {dimension_numbers = #tpu.dot_dimension_numbers<[1], [0], [0], [1], [0, 0, 1, 1], [], []>} : vector<8x32xf32>, vector<32x32xf32>, vector<8x32xf32> -> vector<8x32xf32>
    %17 = vector.broadcast %5 : vector<1x32xf32> to vector<8x32xf32>
    %18 = arith.addf %16, %17 : vector<8x32xf32>
    %cst_21 = arith.constant dense<0.000000e+00> : vector<72x64xf32>
    %19 = tpu.matmul %1, %12, %cst_21 {dimension_numbers = #tpu.dot_dimension_numbers<[1], [0], [0], [1], [0, 0, 1, 1], [], []>} : vector<72x32xf32>, vector<32x64xf32>, vector<72x64xf32> -> vector<72x64xf32>
    %20 = vector.broadcast %14 : vector<1x64xf32> to vector<72x64xf32>
    %21 = arith.addf %19, %20 : vector<72x64xf32>
    %22 = tpu.iota {dimensions = array<i32: 0>} : vector<8x72xi32>
    %23 = tpu.iota {dimensions = array<i32: 1>} : vector<8x72xi32>
    %c9_i32 = arith.constant 9 : i32
    %24 = vector.broadcast %c9_i32 : i32 to vector<8x72xi32>
    %25 = arith.muli %22, %24 : vector<8x72xi32>
    %26 = arith.cmpi sge, %23, %25 : vector<8x72xi32>
    %c9_i32_22 = arith.constant 9 : i32
    %27 = vector.broadcast %c9_i32_22 : i32 to vector<8x72xi32>
    %28 = arith.addi %25, %27 : vector<8x72xi32>
    %29 = arith.cmpi slt, %23, %28 : vector<8x72xi32>
    %30 = arith.andi %26, %29 : vector<8x72xi1>
    %cst_23 = arith.constant 0.000000e+00 : f32
    %cst_24 = arith.constant -1.000000e+30 : f32
    %31 = vector.broadcast %cst_23 : f32 to vector<8x72xf32>
    %32 = vector.broadcast %cst_24 : f32 to vector<8x72xf32>
    %33 = arith.select %30, %31, %32 : vector<8x72xi1>, vector<8x72xf32>
    %34 = tpu.transpose %21, [1, 0] : vector<72x64xf32> -> vector<64x72xf32>
    %cst_25 = arith.constant 0.000000e+00 : f32
    %35 = vector.broadcast %cst_25 : f32 to vector<8x32xf32>
    %36 = vector.extract_strided_slice %18 {offsets = [0, 0], sizes = [8, 8], strides = [1, 1]} : vector<8x32xf32> to vector<8x8xf32>
    %37 = vector.extract_strided_slice %34 {offsets = [0, 0], sizes = [8, 72], strides = [1, 1]} : vector<64x72xf32> to vector<8x72xf32>
    %38 = vector.extract_strided_slice %21 {offsets = [0, 32], sizes = [72, 8], strides = [1, 1]} : vector<72x64xf32> to vector<72x8xf32>
    %cst_26 = arith.constant dense<0.000000e+00> : vector<8x72xf32>
    %39 = tpu.matmul %36, %37, %cst_26 {dimension_numbers = #tpu.dot_dimension_numbers<[1], [0], [0], [1], [0, 0, 1, 1], [], []>} : vector<8x8xf32>, vector<8x72xf32>, vector<8x72xf32> -> vector<8x72xf32>
    %cst_27 = arith.constant 0.353553385 : f32
    %40 = vector.broadcast %cst_27 : f32 to vector<8x72xf32>
    %41 = arith.mulf %39, %40 : vector<8x72xf32>
    %42 = arith.addf %41, %33 : vector<8x72xf32>
    %43 = math.exp %42 : vector<8x72xf32>
    %cst_28 = arith.constant dense<0.000000e+00> : vector<8xf32>
    %44 = vector.multi_reduction <add>, %43, %cst_28 [1] : vector<8x72xf32> to vector<8xf32>
    %45 = vector.shape_cast %44 : vector<8xf32> to vector<8x1xf32>
    %cst_29 = arith.constant dense<0.000000e+00> : vector<8x8xf32>
    %46 = tpu.matmul %43, %38, %cst_29 {dimension_numbers = #tpu.dot_dimension_numbers<[1], [0], [0], [1], [0, 0, 1, 1], [], []>} : vector<8x72xf32>, vector<72x8xf32>, vector<8x8xf32> -> vector<8x8xf32>
    %47 = tpu.reciprocal %45 : vector<8x1xf32> -> vector<8x1xf32>
    %48 = vector.broadcast %47 : vector<8x1xf32> to vector<8x8xf32>
    %49 = arith.mulf %46, %48 : vector<8x8xf32>
    %50 = vector.extract_strided_slice %3 {offsets = [0, 0], sizes = [8, 32], strides = [1, 1]} : vector<32x32xf32> to vector<8x32xf32>
    %cst_30 = arith.constant dense<0.000000e+00> : vector<8x32xf32>
    %51 = tpu.matmul %49, %50, %cst_30 {dimension_numbers = #tpu.dot_dimension_numbers<[1], [0], [0], [1], [0, 0, 1, 1], [], []>} : vector<8x8xf32>, vector<8x32xf32>, vector<8x32xf32> -> vector<8x32xf32>
    %52 = arith.addf %35, %51 : vector<8x32xf32>
    %53 = vector.extract_strided_slice %18 {offsets = [0, 8], sizes = [8, 8], strides = [1, 1]} : vector<8x32xf32> to vector<8x8xf32>
    %54 = vector.extract_strided_slice %34 {offsets = [8, 0], sizes = [8, 72], strides = [1, 1]} : vector<64x72xf32> to vector<8x72xf32>
    %55 = vector.extract_strided_slice %21 {offsets = [0, 40], sizes = [72, 8], strides = [1, 1]} : vector<72x64xf32> to vector<72x8xf32>
    %cst_31 = arith.constant dense<0.000000e+00> : vector<8x72xf32>
    %56 = tpu.matmul %53, %54, %cst_31 {dimension_numbers = #tpu.dot_dimension_numbers<[1], [0], [0], [1], [0, 0, 1, 1], [], []>} : vector<8x8xf32>, vector<8x72xf32>, vector<8x72xf32> -> vector<8x72xf32>
    %cst_32 = arith.constant 0.353553385 : f32
    %57 = vector.broadcast %cst_32 : f32 to vector<8x72xf32>
    %58 = arith.mulf %56, %57 : vector<8x72xf32>
    %59 = arith.addf %58, %33 : vector<8x72xf32>
    %60 = math.exp %59 : vector<8x72xf32>
    %cst_33 = arith.constant dense<0.000000e+00> : vector<8xf32>
    %61 = vector.multi_reduction <add>, %60, %cst_33 [1] : vector<8x72xf32> to vector<8xf32>
    %62 = vector.shape_cast %61 : vector<8xf32> to vector<8x1xf32>
    %cst_34 = arith.constant dense<0.000000e+00> : vector<8x8xf32>
    %63 = tpu.matmul %60, %55, %cst_34 {dimension_numbers = #tpu.dot_dimension_numbers<[1], [0], [0], [1], [0, 0, 1, 1], [], []>} : vector<8x72xf32>, vector<72x8xf32>, vector<8x8xf32> -> vector<8x8xf32>
    %64 = tpu.reciprocal %62 : vector<8x1xf32> -> vector<8x1xf32>
    %65 = vector.broadcast %64 : vector<8x1xf32> to vector<8x8xf32>
    %66 = arith.mulf %63, %65 : vector<8x8xf32>
    %67 = vector.extract_strided_slice %3 {offsets = [8, 0], sizes = [8, 32], strides = [1, 1]} : vector<32x32xf32> to vector<8x32xf32>
    %cst_35 = arith.constant dense<0.000000e+00> : vector<8x32xf32>
    %68 = tpu.matmul %66, %67, %cst_35 {dimension_numbers = #tpu.dot_dimension_numbers<[1], [0], [0], [1], [0, 0, 1, 1], [], []>} : vector<8x8xf32>, vector<8x32xf32>, vector<8x32xf32> -> vector<8x32xf32>
    %69 = arith.addf %52, %68 : vector<8x32xf32>
    %70 = vector.extract_strided_slice %18 {offsets = [0, 16], sizes = [8, 8], strides = [1, 1]} : vector<8x32xf32> to vector<8x8xf32>
    %71 = vector.extract_strided_slice %34 {offsets = [16, 0], sizes = [8, 72], strides = [1, 1]} : vector<64x72xf32> to vector<8x72xf32>
    %72 = vector.extract_strided_slice %21 {offsets = [0, 48], sizes = [72, 8], strides = [1, 1]} : vector<72x64xf32> to vector<72x8xf32>
    %cst_36 = arith.constant dense<0.000000e+00> : vector<8x72xf32>
    %73 = tpu.matmul %70, %71, %cst_36 {dimension_numbers = #tpu.dot_dimension_numbers<[1], [0], [0], [1], [0, 0, 1, 1], [], []>} : vector<8x8xf32>, vector<8x72xf32>, vector<8x72xf32> -> vector<8x72xf32>
    %cst_37 = arith.constant 0.353553385 : f32
    %74 = vector.broadcast %cst_37 : f32 to vector<8x72xf32>
    %75 = arith.mulf %73, %74 : vector<8x72xf32>
    %76 = arith.addf %75, %33 : vector<8x72xf32>
    %77 = math.exp %76 : vector<8x72xf32>
    %cst_38 = arith.constant dense<0.000000e+00> : vector<8xf32>
    %78 = vector.multi_reduction <add>, %77, %cst_38 [1] : vector<8x72xf32> to vector<8xf32>
    %79 = vector.shape_cast %78 : vector<8xf32> to vector<8x1xf32>
    %cst_39 = arith.constant dense<0.000000e+00> : vector<8x8xf32>
    %80 = tpu.matmul %77, %72, %cst_39 {dimension_numbers = #tpu.dot_dimension_numbers<[1], [0], [0], [1], [0, 0, 1, 1], [], []>} : vector<8x72xf32>, vector<72x8xf32>, vector<8x8xf32> -> vector<8x8xf32>
    %81 = tpu.reciprocal %79 : vector<8x1xf32> -> vector<8x1xf32>
    %82 = vector.broadcast %81 : vector<8x1xf32> to vector<8x8xf32>
    %83 = arith.mulf %80, %82 : vector<8x8xf32>
    %84 = vector.extract_strided_slice %3 {offsets = [16, 0], sizes = [8, 32], strides = [1, 1]} : vector<32x32xf32> to vector<8x32xf32>
    %cst_40 = arith.constant dense<0.000000e+00> : vector<8x32xf32>
    %85 = tpu.matmul %83, %84, %cst_40 {dimension_numbers = #tpu.dot_dimension_numbers<[1], [0], [0], [1], [0, 0, 1, 1], [], []>} : vector<8x8xf32>, vector<8x32xf32>, vector<8x32xf32> -> vector<8x32xf32>
    %86 = arith.addf %69, %85 : vector<8x32xf32>
    %87 = vector.extract_strided_slice %18 {offsets = [0, 24], sizes = [8, 8], strides = [1, 1]} : vector<8x32xf32> to vector<8x8xf32>
    %88 = vector.extract_strided_slice %34 {offsets = [24, 0], sizes = [8, 72], strides = [1, 1]} : vector<64x72xf32> to vector<8x72xf32>
    %89 = vector.extract_strided_slice %21 {offsets = [0, 56], sizes = [72, 8], strides = [1, 1]} : vector<72x64xf32> to vector<72x8xf32>
    %cst_41 = arith.constant dense<0.000000e+00> : vector<8x72xf32>
    %90 = tpu.matmul %87, %88, %cst_41 {dimension_numbers = #tpu.dot_dimension_numbers<[1], [0], [0], [1], [0, 0, 1, 1], [], []>} : vector<8x8xf32>, vector<8x72xf32>, vector<8x72xf32> -> vector<8x72xf32>
    %cst_42 = arith.constant 0.353553385 : f32
    %91 = vector.broadcast %cst_42 : f32 to vector<8x72xf32>
    %92 = arith.mulf %90, %91 : vector<8x72xf32>
    %93 = arith.addf %92, %33 : vector<8x72xf32>
    %94 = math.exp %93 : vector<8x72xf32>
    %cst_43 = arith.constant dense<0.000000e+00> : vector<8xf32>
    %95 = vector.multi_reduction <add>, %94, %cst_43 [1] : vector<8x72xf32> to vector<8xf32>
    %96 = vector.shape_cast %95 : vector<8xf32> to vector<8x1xf32>
    %cst_44 = arith.constant dense<0.000000e+00> : vector<8x8xf32>
    %97 = tpu.matmul %94, %89, %cst_44 {dimension_numbers = #tpu.dot_dimension_numbers<[1], [0], [0], [1], [0, 0, 1, 1], [], []>} : vector<8x72xf32>, vector<72x8xf32>, vector<8x8xf32> -> vector<8x8xf32>
    %98 = tpu.reciprocal %96 : vector<8x1xf32> -> vector<8x1xf32>
    %99 = vector.broadcast %98 : vector<8x1xf32> to vector<8x8xf32>
    %100 = arith.mulf %97, %99 : vector<8x8xf32>
    %101 = vector.extract_strided_slice %3 {offsets = [24, 0], sizes = [8, 32], strides = [1, 1]} : vector<32x32xf32> to vector<8x32xf32>
    %cst_45 = arith.constant dense<0.000000e+00> : vector<8x32xf32>
    %102 = tpu.matmul %100, %101, %cst_45 {dimension_numbers = #tpu.dot_dimension_numbers<[1], [0], [0], [1], [0, 0, 1, 1], [], []>} : vector<8x8xf32>, vector<8x32xf32>, vector<8x32xf32> -> vector<8x32xf32>
    %103 = arith.addf %86, %102 : vector<8x32xf32>
    %104 = vector.broadcast %6 : vector<1x32xf32> to vector<8x32xf32>
    %105 = arith.addf %103, %104 : vector<8x32xf32>
    %106 = arith.addf %0, %105 : vector<8x32xf32>
    %cst_46 = arith.constant dense<0.000000e+00> : vector<8xf32>
    %107 = vector.multi_reduction <add>, %106, %cst_46 [1] : vector<8x32xf32> to vector<8xf32>
    %108 = vector.shape_cast %107 : vector<8xf32> to vector<8x1xf32>
    %cst_47 = arith.constant 3.200000e+01 : f32
    %109 = vector.broadcast %cst_47 : f32 to vector<8x1xf32>
    %110 = arith.divf %108, %109 : vector<8x1xf32>
    %111 = vector.broadcast %110 : vector<8x1xf32> to vector<8x32xf32>
    %112 = arith.subf %106, %111 : vector<8x32xf32>
    %113 = arith.mulf %112, %112 : vector<8x32xf32>
    %cst_48 = arith.constant dense<0.000000e+00> : vector<8xf32>
    %114 = vector.multi_reduction <add>, %113, %cst_48 [1] : vector<8x32xf32> to vector<8xf32>
    %115 = vector.shape_cast %114 : vector<8xf32> to vector<8x1xf32>
    %cst_49 = arith.constant 3.200000e+01 : f32
    %116 = vector.broadcast %cst_49 : f32 to vector<8x1xf32>
    %117 = arith.divf %115, %116 : vector<8x1xf32>
    %cst_50 = arith.constant 9.99999974E-6 : f32
    %118 = vector.broadcast %cst_50 : f32 to vector<8x1xf32>
    %119 = arith.addf %117, %118 : vector<8x1xf32>
    %120 = math.rsqrt %119 : vector<8x1xf32>
    %121 = vector.broadcast %120 : vector<8x1xf32> to vector<8x32xf32>
    %122 = arith.mulf %112, %121 : vector<8x32xf32>
    %123 = vector.broadcast %8 : vector<1x32xf32> to vector<8x32xf32>
    %124 = arith.mulf %122, %123 : vector<8x32xf32>
    %125 = vector.broadcast %9 : vector<1x32xf32> to vector<8x32xf32>
    %126 = arith.addf %124, %125 : vector<8x32xf32>
    %cst_51 = arith.constant dense<0.000000e+00> : vector<8x64xf32>
    %127 = tpu.matmul %126, %13, %cst_51 {dimension_numbers = #tpu.dot_dimension_numbers<[1], [0], [0], [1], [0, 0, 1, 1], [], []>} : vector<8x32xf32>, vector<32x64xf32>, vector<8x64xf32> -> vector<8x64xf32>
    %128 = vector.broadcast %15 : vector<1x64xf32> to vector<8x64xf32>
    %129 = arith.addf %127, %128 : vector<8x64xf32>
    %cst_52 = arith.constant 0.000000e+00 : f32
    %130 = vector.broadcast %cst_52 : f32 to vector<8x64xf32>
    %131 = arith.maximumf %129, %130 : vector<8x64xf32>
    %cst_53 = arith.constant dense<0.000000e+00> : vector<8x32xf32>
    %132 = tpu.matmul %131, %4, %cst_53 {dimension_numbers = #tpu.dot_dimension_numbers<[1], [0], [0], [1], [0, 0, 1, 1], [], []>} : vector<8x64xf32>, vector<64x32xf32>, vector<8x32xf32> -> vector<8x32xf32>
    %133 = vector.broadcast %7 : vector<1x32xf32> to vector<8x32xf32>
    %134 = arith.addf %132, %133 : vector<8x32xf32>
    %135 = arith.addf %126, %134 : vector<8x32xf32>
    %cst_54 = arith.constant dense<0.000000e+00> : vector<8xf32>
    %136 = vector.multi_reduction <add>, %135, %cst_54 [1] : vector<8x32xf32> to vector<8xf32>
    %137 = vector.shape_cast %136 : vector<8xf32> to vector<8x1xf32>
    %cst_55 = arith.constant 3.200000e+01 : f32
    %138 = vector.broadcast %cst_55 : f32 to vector<8x1xf32>
    %139 = arith.divf %137, %138 : vector<8x1xf32>
    %140 = vector.broadcast %139 : vector<8x1xf32> to vector<8x32xf32>
    %141 = arith.subf %135, %140 : vector<8x32xf32>
    %142 = arith.mulf %141, %141 : vector<8x32xf32>
    %cst_56 = arith.constant dense<0.000000e+00> : vector<8xf32>
    %143 = vector.multi_reduction <add>, %142, %cst_56 [1] : vector<8x32xf32> to vector<8xf32>
    %144 = vector.shape_cast %143 : vector<8xf32> to vector<8x1xf32>
    %cst_57 = arith.constant 3.200000e+01 : f32
    %145 = vector.broadcast %cst_57 : f32 to vector<8x1xf32>
    %146 = arith.divf %144, %145 : vector<8x1xf32>
    %cst_58 = arith.constant 9.99999974E-6 : f32
    %147 = vector.broadcast %cst_58 : f32 to vector<8x1xf32>
    %148 = arith.addf %146, %147 : vector<8x1xf32>
    %149 = math.rsqrt %148 : vector<8x1xf32>
    %150 = vector.broadcast %149 : vector<8x1xf32> to vector<8x32xf32>
    %151 = arith.mulf %141, %150 : vector<8x32xf32>
    %152 = vector.broadcast %10 : vector<1x32xf32> to vector<8x32xf32>
    %153 = arith.mulf %151, %152 : vector<8x32xf32>
    %154 = vector.broadcast %11 : vector<1x32xf32> to vector<8x32xf32>
    %155 = arith.addf %153, %154 : vector<8x32xf32>
    %c0_59 = arith.constant 0 : index
    %c0_60 = arith.constant 0 : index
    %156 = vector.load %arg5[%c0_59, %c0_60] : memref<32x16xf32, #tpu.memory_space<vmem>>, vector<32x16xf32>
    %cst_61 = arith.constant dense<0.000000e+00> : vector<8x16xf32>
    %157 = tpu.matmul %155, %156, %cst_61 {dimension_numbers = #tpu.dot_dimension_numbers<[1], [0], [0], [1], [0, 0, 1, 1], [], []>} : vector<8x32xf32>, vector<32x16xf32>, vector<8x16xf32> -> vector<8x16xf32>
    %158 = arith.mulf %157, %157 : vector<8x16xf32>
    %cst_62 = arith.constant dense<0.000000e+00> : vector<8xf32>
    %159 = vector.multi_reduction <add>, %158, %cst_62 [1] : vector<8x16xf32> to vector<8xf32>
    %160 = vector.shape_cast %159 : vector<8xf32> to vector<8x1xf32>
    %cst_63 = arith.constant 9.99999996E-13 : f32
    %161 = vector.broadcast %cst_63 : f32 to vector<8x1xf32>
    %162 = arith.addf %160, %161 : vector<8x1xf32>
    %163 = math.rsqrt %162 : vector<8x1xf32>
    %164 = vector.broadcast %163 : vector<8x1xf32> to vector<8x16xf32>
    %165 = arith.mulf %157, %164 : vector<8x16xf32>
    %c0_64 = arith.constant 0 : index
    %c0_65 = arith.constant 0 : index
    %166 = vector.load %arg6[%c0_64, %c0_65] : memref<8x16xf32, #tpu.memory_space<vmem>>, vector<8x16xf32>
    tpu.vector_store %arg6[%c0_64, %c0_65], %165 {strides = array<i32>} : memref<8x16xf32, #tpu.memory_space<vmem>>, vector<8x16xf32>,
    return
  }
  func.func @transform_0(%arg0: i32) -> (i32, i32) {
    %c0_i32 = arith.constant 0 : i32
    %c0_i32_0 = arith.constant 0 : i32
    return %arg0, %c0_i32 : i32, i32
  }
  func.func @transform_1(%arg0: i32) -> (i32, i32) {
    %c0_i32 = arith.constant 0 : i32
    %c0_i32_0 = arith.constant 0 : i32
    return %arg0, %c0_i32 : i32, i32
  }
  func.func @transform_2(%arg0: i32) -> (i32, i32) {
    %c0_i32 = arith.constant 0 : i32
    %c0_i32_0 = arith.constant 0 : i32
    %c0_i32_1 = arith.constant 0 : i32
    return %c0_i32, %c0_i32_0 : i32, i32
  }
  func.func @transform_3(%arg0: i32) -> (i32, i32) {
    %c0_i32 = arith.constant 0 : i32
    %c0_i32_0 = arith.constant 0 : i32
    %c0_i32_1 = arith.constant 0 : i32
    return %c0_i32, %c0_i32_0 : i32, i32
  }
  func.func @transform_4(%arg0: i32) -> (i32, i32) {
    %c0_i32 = arith.constant 0 : i32
    %c0_i32_0 = arith.constant 0 : i32
    %c0_i32_1 = arith.constant 0 : i32
    return %c0_i32, %c0_i32_0 : i32, i32
  }
  func.func @transform_5(%arg0: i32) -> (i32, i32) {
    %c0_i32 = arith.constant 0 : i32
    %c0_i32_0 = arith.constant 0 : i32
    return %arg0, %c0_i32 : i32, i32
  }
}

</mosaic_0001>

<bundles_post_ra>
// kernel: tpu_custom_call.1
= control target key start
LH: loop header
LB: loop body
LE: loop exit
PB: predicated region body
PF: predicated region fallthrough
CT: control target
= control target key end

     0   :  { %vm65_vm0 = vcmask 261120   ;;  %s1548_s0 = inlined_call_operand.vmem [shape: f32[8,32], index: 0, kind: input, shape index: {}]   ;;  %s1549_s1 = inlined_call_operand.vmem [shape: f32[72,32], index: 1, kind: input, shape index: {}]   ;;  %s1550_s2 = inlined_call_operand.vmem [shape: f32[184,32], index: 2, kind: input, shape index: {}]   ;;  %s1551_s3 = inlined_call_operand.vmem [shape: f32[80,64], index: 3, kind: input, shape index: {}]   ;;  %s1552_s4 = inlined_call_operand.vmem [shape: f32[32,16], index: 4, kind: input, shape index: {}]   ;;  %s1553_s5 = inlined_call_operand.hbm [shape: f32[8,16], index: 5, kind: output, shape index: {}]  }
   0x1   :  { %v57_v0 = vld [vmem:[%s1551_s3 + $0x18] sm:$0xff]  ;;  %v56_v1 = vld [vmem:[%s1551_s3 + $0x10] sm:$0xff]  ;;  %v55_v2 = vld [vmem:[%s1551_s3 + $0x8] sm:$0xff] }
   0x2   :  { %129 = vmatpush.msra.mxu1 %v57_v0  ;;  %v54_v3 = vld [vmem:[%s1551_s3] sm:$0xff] }
   0x3   :  { %v22_v4 = vld [vmem:[%s1549_s1] sm:$0xff] }
   0x4   :  { %130 = vmatpush.msra.mxu1 %v56_v1 }
   0x6   :  { %131 = vmatpush.msra.mxu1 %v55_v2 }
   0x7   :  { %10 = vsyncpa [#allocation3], 0  ;;  %v23_v5 = vld [vmem:[%s1549_s1 + $0x8] sm:$0xff]  ;;  %v24_v6 = vld [vmem:[%s1549_s1 + $0x10] sm:$0xff]  ;;  %s1169_s30 = smov 120   ;;  %vm171_vm1 = vcmask 64512   ;;  %v161_v59 = vlaneseq }
   0x8   :  { %132 = vmatpush.msra.mxu1 %v54_v3  ;;  %v25_v7 = vld [vmem:[%s1549_s1 + $0x18] sm:$0xff]  ;;  %v26_v8 = vld [vmem:[%s1549_s1 + $0x20] sm:$0xff]  ;;  %v33_v10 = vld [vmem:[%s1550_s2 + $0x10] sm:$0xff]  ;;  %s1171_s6 = smov 96   ;;  %s1172_s7 = smov 88   ;;  %vm226_vm5 = vcmask 588800  }
   0x9   :  { %960 = vmatmul.msk.f32.vlgmr.msra.gmra.mxu1 %vm65_vm0, %v22_v4  ;;  %v34_v9 = vld [vmem:[%s1550_s2 + $0x18] sm:$0xff]  ;;  %v32_v11 = vld [vmem:[%s1550_s2 + $0x8] sm:$0xff]  ;;  %v31_v12 = vld [vmem:[%s1550_s2] sm:$0xff]  ;;  %s1173_s10 = smov 104   ;;  %s1174_s11 = smov 80   ;;  %v162_v63 = vshrl.u32 %v161_v59, 7 }
   0xa   :  { %81 = vmatpush.msra.mxu0 %v34_v9  ;;  %v27_v13 = vld [vmem:[%s1549_s1 + $0x28] sm:$0xff]  ;;  %v1259_v14 = vld [vmem:[%s1548_s0] sm:$0xff]  ;;  %v28_v15 = vld [vmem:[%s1549_s1 + $0x30] sm:$0xff]  ;;  %v164_v4 = vand.u32 127, %v161_v59  ;;  %s1176_s16 = smov 72   ;;  %s950_s14 = sshll.u32 %s1553_s5, 4  ;;  %s951_s14 = int_to_ptr.hbm [resolvable:$true] %s950_s14 }
   0xb   :  { %v29_v16 = vld [vmem:[%s1549_s1 + $0x38] sm:$0xff]  ;;  %v30_v17 = vld [vmem:[%s1549_s1 + $0x40] sm:$0xff]  ;;  %s1170_s1 = smov 112   ;;  %v165_v0 = vmul.u32 9, %v162_v63 }
   0xc   :  { %82 = vmatpush.msra.mxu0 %v33_v10  ;;  %v1110_v22 = vld [vmem:[%s1551_s3 + $0x40] ss:$0 sm:$0xff] }
   0xd   :  { %v1111_v40 = vld [vmem:[%s1550_s2 + $0x80] ss:$0 sm:$0xff]  ;;  %vm166_vm2 = vcmp.ge.s32.totalorder %v164_v4, %v165_v0 }
   0xe   :  { %83 = vmatpush.msra.mxu0 %v32_v11  ;;  %v1175_v11 = vmov -1e+30  }
  0x10   :  { %84 = vmatpush.msra.mxu0 %v31_v12 }
  0x11   :  { %961 = vmatmul.msk.f32.gmra.mxu1 %vm65_vm0, %v23_v5  ;;  %959 = vmatmul.msk.f32.vlgmr.msra.gmra.mxu0 %vm65_vm0, %v1259_v14  ;;  %v167_v5 = vadd.s32 9, %v165_v0 }
  0x13   :  { %vm168_vm3 = vcmp.lt.s32.totalorder %v164_v4, %v167_v5 }
  0x14   :  { %vm169_vm4 = vmand %vm166_vm2, %vm168_vm3 }
  0x15   :  { %v1398_v12 = vsel %vm169_vm4, 0.0, %v1175_v11 }
  0x19   :  { %962 = vmatmul.msk.f32.gmra.mxu1 %vm65_vm0, %v24_v6 }
  0x21   :  { %963 = vmatmul.msk.f32.gmra.mxu1 %vm65_vm0, %v25_v7 }
  0x29   :  { %964 = vmatmul.msk.f32.gmra.mxu1 %vm65_vm0, %v26_v8 }
  0x31   :  { %965 = vmatmul.msk.f32.gmra.mxu1 %vm65_vm0, %v27_v13 }
  0x39   :  { %966 = vmatmul.msk.f32.gmra.mxu1 %vm65_vm0, %v28_v15 }
  0x41   :  { %967 = vmatmul.msk.f32.gmra.mxu1 %vm65_vm0, %v29_v16 }
  0x49   :  { %968 = vmatmul.msk.f32.gmra.mxu1 %vm65_vm0, %v30_v17 }
  0x86   :  { %v134_v18 = vpop.f32.mrf.mxu1 }
  0x87   :  { %v1287_v28 = vadd.f32 %v1110_v22, %v134_v18 }
  0x8e   :  { %v137_v19 = vpop.f32.mrf.mxu1  ;;  %v86_v41 = vpop.f32.mrf.mxu0 }
  0x8f   :  { %v138_v35 = vadd.f32 %v1110_v22, %v137_v19  ;;  %v87_v42 = vadd.f32 %v1111_v40, %v86_v41  ;;  %v36_v41 = vld [vmem:[%s1550_s2 + $0x28] sm:$0xff] }
  0x96   :  { %v140_v20 = vpop.f32.mrf.mxu1 }
  0x97   :  { %v141_v37 = vadd.f32 %v1110_v22, %v140_v20 }
  0x99   :  { %v1332_v43 = vpack.i.bf16 %v138_v35, %v141_v37 }
  0x9e   :  { %v143_v21 = vpop.f32.mrf.mxu1 }
  0x9f   :  { %v1283_v26 = vadd.f32 %v1110_v22, %v143_v21 }
  0xa6   :  { %v146_v23 = vpop.f32.mrf.mxu1 }
  0xa7   :  { %v1279_v24 = vadd.f32 %v1110_v22, %v146_v23 }
  0xa9   :  { %305 = vrot.lane.b32.xlu2 %v1279_v24, %s1169_s30  ;;  %v1310_v38 = vpack.i.bf16 %v1283_v26, %v1279_v24 }
  0xae   :  { %v149_v25 = vpop.f32.mrf.mxu1 }
  0xaf   :  { %v150_v31 = vadd.f32 %v1110_v22, %v149_v25 }
  0xb1   :  { %303 = vrot.lane.b32.xlu2 %v1283_v26, %s1169_s30 }
  0xb6   :  { %v152_v27 = vpop.f32.mrf.mxu1 }
  0xb7   :  { %v153_v29 = vadd.f32 %v1110_v22, %v152_v27 }
  0xb9   :  { %309 = vrot.lane.b32.xlu1 %v153_v29, %s1169_s30  ;;  %297 = vrot.lane.b32.xlu2 %v1287_v28, %s1169_s30  ;;  %v1294_v36 = vpack.i.bf16 %v150_v31, %v153_v29 }
  0xbe   :  { %v155_v30 = vpop.f32.mrf.mxu1 }
  0xbf   :  { %v156_v32 = vadd.f32 %v1110_v22, %v155_v30 }
  0xc1   :  { %307 = vrot.lane.b32.xlu1 %v150_v31, %s1169_s30  ;;  %489 = vrot.lane.b32.xlu2 %v156_v32, %s1170_s1 }
  0xc6   :  { %v158_v33 = vpop.f32.mrf.mxu1 }
  0xc7   :  { %v159_v34 = vadd.f32 %v1110_v22, %v158_v33 }
  0xc9   :  { %313 = vrot.lane.b32.xlu0 %v159_v34, %s1169_s30  ;;  %969 = vmatpush.xpose.msk.msra.mxu2 %vm171_vm1, %v159_v34  ;;  %v1312_v39 = vpack.i.bf16 %v156_v32, %v159_v34 }
  0xca   :  { %299 = vrot.lane.b32.xlu1 %v138_v35, %s1169_s30  ;;  %1031 = vrot.lane.b32.xlu2 %v1294_v36, %s1171_s6 }
  0xcd   :  { %970 = vmatpush.xpose.msk.msra.mxu2 %vm171_vm1, %v156_v32 }
  0xd1   :  { %311 = vrot.lane.b32.xlu0 %v156_v32, %s1169_s30  ;;  %971 = vmatpush.xpose.msk.msra.mxu2 %vm171_vm1, %v153_v29 }
  0xd2   :  { %487 = vrot.lane.b32.xlu1 %v153_v29, %s1170_s1  ;;  %1046 = vrot.lane.b32.xlu2 %v1294_v36, %s1172_s7 }
  0xd5   :  { %972 = vmatpush.xpose.msk.msra.mxu2 %vm171_vm1, %v150_v31 }
  0xd9   :  { %973 = vmatpush.xpose.msk.msra.mxu2 %vm171_vm1, %v1279_v24  ;;  %301 = vrot.lane.b32.xlu0 %v141_v37, %s1169_s30 }
  0xda   :  { %1036 = vrot.lane.b32.xlu1 %v1310_v38, %s1171_s6  ;;  %1056 = vrot.lane.b32.xlu2 %v1312_v39, %s1172_s7 }
  0xdd   :  { %974 = vmatpush.xpose.msk.msra.mxu2 %vm171_vm1, %v1283_v26 }
  0xe1   :  { %975 = vmatpush.xpose.msk.msra.mxu2 %vm171_vm1, %v141_v37  ;;  %295 = vrot.lane.b32.xlu0 %v87_v42, %s1169_s30 }
  0xe2   :  { %491 = vrot.lane.b32.xlu1 %v159_v34, %s1170_s1  ;;  %1061 = vrot.lane.b32.xlu2 %v1310_v38, %s1172_s7 }
  0xe5   :  { %976 = vmatpush.xpose.msk.msra.mxu2 %vm171_vm1, %v138_v35 }
  0xe9   :  { %977 = vmatpush.xpose.msk.msra.mxu2 %vm171_vm1, %v1287_v28  ;;  %485 = vrot.lane.b32.xlu0 %v150_v31, %s1170_s1 }
  0xea   :  { %1041 = vrot.lane.b32.xlu1 %v1332_v43, %s1171_s6  ;;  %477 = vrot.lane.b32.xlu2 %v138_v35, %s1170_s1 }
  0xec   :  { %978 = vmatmul.msk.f32.vlgmr.msra.gmra.mxu2 %vm171_vm1, %v87_v42 }
  0xed   :  { %445 = vmatpush.msrb.mxu2 %v36_v41 }
  0xf1   :  { %483 = vrot.lane.b32.xlu0 %v1279_v24, %s1170_s1 }
  0xf2   :  { %230 = vrot.lane.b32.xlu1 %v1287_v28, %s1171_s6  ;;  %473 = vrot.lane.b32.xlu2 %v87_v42, %s1170_s1 }
  0xf9   :  { %1051 = vrot.lane.b32.xlu0 %v1312_v39, %s1171_s6 }
  0xfa   :  { %1066 = vrot.lane.b32.xlu1 %v1332_v43, %s1172_s7  ;;  %645 = vrot.lane.b32.xlu2 %v156_v32, %s1173_s10 }
 0x101   :  { %481 = vrot.lane.b32.xlu0 %v1283_v26, %s1170_s1 }
 0x102   :  { %475 = vrot.lane.b32.xlu1 %v1287_v28, %s1170_s1  ;;  %641 = vrot.lane.b32.xlu2 %v150_v31, %s1173_s10 }
 0x103   :  { %v306_v44 = vpop.permute.xlu2 %305 }
 0x109   :  { %479 = vrot.lane.b32.xlu0 %v141_v37, %s1170_s1 }
 0x10a   :  { %639 = vrot.lane.b32.xlu2 %v1279_v24, %s1173_s10 }
 0x10b   :  { %v304_v45 = vpop.permute.xlu2 %303 }
 0x111   :  { %362 = vrot.lane.b32.xlu0 %v1287_v28, %s1172_s7 }
 0x112   :  { %637 = vrot.lane.b32.xlu2 %v1283_v26, %s1173_s10 }
 0x113   :  { %v298_v47 = vpop.permute.xlu2 %297 }
 0x119   :  { %643 = vrot.lane.b32.xlu0 %v153_v29, %s1173_s10 }
 0x11a   :  { %635 = vrot.lane.b32.xlu2 %v141_v37, %s1173_s10 }
 0x11b   :  { %v490_v50 = vpop.permute.xlu2 %489 }
 0x121   :  { %1071 = vrot.lane.b32.xlu0 %v1294_v36, %s1174_s11 }
 0x122   :  { %633 = vrot.lane.b32.xlu2 %v138_v35, %s1173_s10 }
 0x124   :  { %v1032_v53 = vpop.permute.xlu2 %1031 }
 0x125   :  { %v1033_v16 = vunpack.i.l.bf16 %v1032_v53  ;;  %v1034_v18 = vunpack.i.h.bf16 %v1032_v53 }
 0x129   :  { %647 = vrot.lane.b32.xlu0 %v159_v34, %s1173_s10 }
 0x12a   :  { %629 = vrot.lane.b32.xlu2 %v87_v42, %s1173_s10 }
 0x12b   :  { %v310_v46 = vpop.permute.xlu1 %309 }
 0x12c   :  { %v1382_v56 = vpop.permute.xlu2 %1046 }
 0x12d   :  { %v1048_v34 = vunpack.i.l.bf16 %v1382_v56  ;;  %v1049_v40 = vunpack.i.h.bf16 %v1382_v56 }
 0x131   :  { %1076 = vrot.lane.b32.xlu0 %v1312_v39, %s1174_s11 }
 0x133   :  { %v308_v48 = vpop.permute.xlu1 %307 }
 0x134   :  { %v1387_v60 = vpop.permute.xlu2 %1056 }
 0x135   :  { %v1058_v31 = vunpack.i.l.bf16 %v1387_v60  ;;  %v1059_v32 = vunpack.i.h.bf16 %v1387_v60 }
 0x139   :  { %1081 = vrot.lane.b32.xlu0 %v1310_v38, %s1174_s11 }
 0x13b   :  { %v314_v49 = vpop.permute.xlu0 %313 }
 0x13c   :  { %980 = vmatpush.xpose.msk.msrb.mxu0 %vm171_vm1, %v314_v49  ;;  %v300_v51 = vpop.permute.xlu1 %299  ;;  %v1393_v2 = vpop.permute.xlu2 %1061 }
 0x13d   :  { %v1063_v42 = vunpack.i.l.bf16 %v1393_v2 }
 0x141   :  { %1086 = vrot.lane.b32.xlu0 %v1332_v43, %s1174_s11 }
 0x143   :  { %v312_v52 = vpop.permute.xlu0 %311 }
 0x144   :  { %981 = vmatpush.xpose.msk.msrb.mxu0 %vm171_vm1, %v312_v52  ;;  %v488_v54 = vpop.permute.xlu1 %487  ;;  %v478_v8 = vpop.permute.xlu2 %477 }
 0x148   :  { %982 = vmatpush.xpose.msk.msrb.mxu0 %vm171_vm1, %v310_v46 }
 0x149   :  { %631 = vrot.lane.b32.xlu0 %v1287_v28, %s1173_s10 }
 0x14b   :  { %v302_v55 = vpop.permute.xlu0 %301 }
 0x14c   :  { %983 = vmatpush.xpose.msk.msrb.mxu0 %vm171_vm1, %v308_v48  ;;  %v1037_v57 = vpop.permute.xlu1 %1036  ;;  %v474_v23 = vpop.permute.xlu2 %473 }
 0x14d   :  { %v1038_v21 = vunpack.i.l.bf16 %v1037_v57  ;;  %v1039_v22 = vunpack.i.h.bf16 %v1037_v57 }
 0x150   :  { %984 = vmatpush.xpose.msk.msrb.mxu0 %vm171_vm1, %v306_v44  ;;  %v1064_v44 = vunpack.i.h.bf16 %v1393_v2 }
 0x153   :  { %v296_v58 = vpop.permute.xlu0 %295 }
 0x154   :  { %985 = vmatpush.xpose.msk.msrb.mxu0 %vm171_vm1, %v304_v45  ;;  %v492_v61 = vpop.permute.xlu1 %491  ;;  %v646_v33 = vpop.permute.xlu2 %645 }
 0x158   :  { %986 = vmatpush.xpose.msk.msrb.mxu0 %vm171_vm1, %v302_v55 }
 0x15b   :  { %v486_v62 = vpop.permute.xlu0 %485 }
 0x15c   :  { %987 = vmatpush.xpose.msk.msrb.mxu0 %vm171_vm1, %v300_v51  ;;  %v1042_v3 = vpop.permute.xlu1 %1041 }
 0x15d   :  { %v1043_v24 = vunpack.i.l.bf16 %v1042_v3  ;;  %v1044_v26 = vunpack.i.h.bf16 %v1042_v3 }
 0x160   :  { %988 = vmatpush.xpose.msk.msrb.mxu0 %vm171_vm1, %v298_v47  ;;  %v642_v47 = vpop.permute.xlu2 %641 }
 0x163   :  { %989 = vmatmul.msk.f32.vlgmr.msrb.gmra.mxu0 %vm171_vm1, %v296_v58  ;;  %v484_v1 = vpop.permute.xlu0 %483 }
 0x164   :  { %993 = vmatpush.xpose.msk.msra.mxu0 %vm171_vm1, %v492_v61  ;;  %v231_v10 = vpop.permute.xlu1 %230 }
 0x168   :  { %994 = vmatpush.xpose.msk.msra.mxu0 %vm171_vm1, %v490_v50  ;;  %v640_v50 = vpop.permute.xlu2 %639 }
 0x16b   :  { %v1052_v6 = vpop.permute.xlu0 %1051 }
 0x16c   :  { %995 = vmatpush.xpose.msk.msra.mxu0 %vm171_vm1, %v488_v54  ;;  %v1053_v7 = vunpack.i.l.bf16 %v1052_v6  ;;  %v1054_v9 = vunpack.i.h.bf16 %v1052_v6  ;;  %v1067_v25 = vpop.permute.xlu1 %1066 }
 0x16d   :  { %v1068_v45 = vunpack.i.l.bf16 %v1067_v25  ;;  %v1069_v48 = vunpack.i.h.bf16 %v1067_v25 }
 0x16e   :  { %267 = vmatpush.msra.mxu3 %v1053_v7  ;;  %v35_v7 = vld [vmem:[%s1550_s2 + $0x20] sm:$0xff] }
 0x16f   :  { %v219_v13 = vpop.f32.mrf.mxu2 }
 0x170   :  { %996 = vmatpush.xpose.msk.msra.mxu0 %vm171_vm1, %v486_v62  ;;  %v222_v15 = vmul.f32 0.35355338, %v219_v13  ;;  %268 = vmatpush.msra.mxu3 %v1054_v9  ;;  %v638_v52 = vpop.permute.xlu2 %637 }
 0x172   :  { %v223_v17 = vadd.f32 %v222_v15, %v1398_v12  ;;  %269 = vmatpush.msra.mxu3 %v1033_v16 }
 0x173   :  { %v482_v19 = vpop.permute.xlu0 %481 }
 0x174   :  { %997 = vmatpush.xpose.msk.msra.mxu0 %vm171_vm1, %v484_v1  ;;  %v224_v20 = vmul.f32 1.442695, %v223_v17  ;;  %270 = vmatpush.msra.mxu3 %v1034_v18  ;;  %v476_v35 = vpop.permute.xlu1 %475 }
 0x176   :  { %1119 = vpow2.f32 %v224_v20  ;;  %271 = vmatpush.msra.mxu3 %v1038_v21 }
 0x178   :  { %998 = vmatpush.xpose.msk.msra.mxu0 %vm171_vm1, %v482_v19  ;;  %272 = vmatpush.msra.mxu3 %v1039_v22  ;;  %v636_v57 = vpop.permute.xlu2 %635 }
 0x17a   :  { %273 = vmatpush.msra.mxu3 %v1043_v24 }
 0x17b   :  { %v480_v27 = vpop.permute.xlu0 %479 }
 0x17c   :  { %v1120_v29 = vpop.eup %1119  ;;  %274 = vmatpush.msra.mxu3 %v1044_v26  ;;  %999 = vmatpush.xpose.msk.msra.mxu0 %vm171_vm1, %v480_v27 }
 0x17d   :  { %v227_v30 = vsel %vm226_vm5, %v1120_v29, 0.0 }
 0x17e   :  { %275 = vmatpush.msra.mxu3 %v231_v10  ;;  %228 = vadd.xlane.f32.xlu0 %v227_v30 }
 0x17f   :  { %979 = vmatmul.msk.f32.vlgmr.msra.gmra.mxu3 %vm226_vm5, %v1120_v29 }
 0x180   :  { %399 = vmatpush.msrb.mxu3 %v1058_v31  ;;  %1000 = vmatpush.xpose.msk.msra.mxu0 %vm171_vm1, %v478_v8  ;;  %v634_v63 = vpop.permute.xlu2 %633 }
 0x182   :  { %400 = vmatpush.msrb.mxu3 %v1059_v32 }
 0x183   :  { %v363_v37 = vpop.permute.xlu0 %362 }
 0x184   :  { %401 = vmatpush.msrb.mxu3 %v1048_v34  ;;  %1001 = vmatpush.xpose.msk.msra.mxu0 %vm171_vm1, %v476_v35 }
 0x186   :  { %402 = vmatpush.msrb.mxu3 %v1049_v40 }
 0x187   :  { %1002 = vmatmul.msk.f32.vlgmr.msra.gmra.mxu0 %vm171_vm1, %v474_v23 }
 0x188   :  { %403 = vmatpush.msrb.mxu3 %v1063_v42  ;;  %v630_v3 = vpop.permute.xlu2 %629 }
 0x18a   :  { %404 = vmatpush.msrb.mxu3 %v1064_v44 }
 0x18b   :  { %v644_v46 = vpop.permute.xlu0 %643 }
 0x18c   :  { %405 = vmatpush.msrb.mxu3 %v1068_v45 }
 0x18e   :  { %406 = vmatpush.msrb.mxu3 %v1069_v48 }
 0x190   :  { %407 = vmatpush.msrb.mxu3 %v363_v37 }
 0x192   :  { %468 = vmatpush.msra.mxu3 %v35_v7 }
 0x193   :  { %v1072_v49 = vpop.permute.xlu0 %1071 }
 0x194   :  { %v1073_v56 = vunpack.i.l.bf16 %v1072_v49  ;;  %v1074_v58 = vunpack.i.h.bf16 %v1072_v49 }
 0x19b   :  { %v648_v51 = vpop.permute.xlu0 %647 }
 0x19c   :  { %1005 = vmatpush.xpose.msk.msrb.mxu1 %vm171_vm1, %v648_v51 }
 0x1a0   :  { %1006 = vmatpush.xpose.msk.msrb.mxu1 %vm171_vm1, %v646_v33 }
 0x1a3   :  { %v1077_v53 = vpop.permute.xlu0 %1076 }
 0x1a4   :  { %v1078_v54 = vunpack.i.l.bf16 %v1077_v53  ;;  %1007 = vmatpush.xpose.msk.msrb.mxu1 %vm171_vm1, %v644_v46  ;;  %v1079_v55 = vunpack.i.h.bf16 %v1077_v53 }
 0x1a6   :  { %577 = vmatpush.msra.mxu2 %v1078_v54 }
 0x1a8   :  { %578 = vmatpush.msra.mxu2 %v1079_v55  ;;  %1008 = vmatpush.xpose.msk.msrb.mxu1 %vm171_vm1, %v642_v47 }
 0x1aa   :  { %579 = vmatpush.msra.mxu2 %v1073_v56 }
 0x1ab   :  { %v1082_v59 = vpop.permute.xlu0 %1081 }
 0x1ac   :  { %v1083_v60 = vunpack.i.l.bf16 %v1082_v59  ;;  %580 = vmatpush.msra.mxu2 %v1074_v58  ;;  %1009 = vmatpush.xpose.msk.msrb.mxu1 %vm171_vm1, %v640_v50  ;;  %v1084_v61 = vunpack.i.h.bf16 %v1082_v59 }
 0x1ae   :  { %581 = vmatpush.msra.mxu2 %v1083_v60 }
 0x1b0   :  { %582 = vmatpush.msra.mxu2 %v1084_v61  ;;  %1010 = vmatpush.xpose.msk.msrb.mxu1 %vm171_vm1, %v638_v52 }
 0x1b3   :  { %v1087_v62 = vpop.permute.xlu0 %1086 }
 0x1b4   :  { %v1088_v0 = vunpack.i.l.bf16 %v1087_v62  ;;  %1011 = vmatpush.xpose.msk.msrb.mxu1 %vm171_vm1, %v636_v57  ;;  %v1089_v1 = vunpack.i.h.bf16 %v1087_v62 }
 0x1b6   :  { %583 = vmatpush.msra.mxu2 %v1088_v0 }
 0x1b8   :  { %584 = vmatpush.msra.mxu2 %v1089_v1  ;;  %1012 = vmatpush.xpose.msk.msrb.mxu1 %vm171_vm1, %v634_v63 }
 0x1bb   :  { %v632_v2 = vpop.permute.xlu0 %631 }
 0x1bc   :  { %1013 = vmatpush.xpose.msk.msrb.mxu1 %vm171_vm1, %v632_v2 }
 0x1bf   :  { %1014 = vmatmul.msk.f32.vlgmr.msrb.gmra.mxu1 %vm171_vm1, %v630_v3 }
 0x1e0   :  { %v352_v4 = vpop.f32.mrf.mxu0 }
 0x1e1   :  { %v355_v5 = vmul.f32 0.35355338, %v352_v4 }
 0x1e3   :  { %v356_v6 = vadd.f32 %v355_v5, %v1398_v12 }
 0x1e5   :  { %v357_v8 = vmul.f32 1.442695, %v356_v6 }
 0x1e7   :  { %1121 = vpow2.f32 %v357_v8 }
 0x1ed   :  { %v1122_v9 = vpop.eup %1121 }
 0x1ee   :  { %990 = vmatmul.msk.f32.vlgmr.msrb.gmra.mxu3 %vm226_vm5, %v1122_v9  ;;  %v359_v10 = vsel %vm226_vm5, %v1122_v9, 0.0 }
 0x1ef   :  { %360 = vadd.xlane.f32.xlu1 %v359_v10 }
 0x1f1   :  { %v229_v11 = vpop.xlane.xlu0 %228 }
 0x1f2   :  { %1123 = vrcp.f32 %v229_v11  ;;  %v291_v17 = vand.u32 2147483648, %v229_v11  ;;  %v289_v19 = vand.u32 2147483647, %v229_v11  ;;  %vm285_vm7 = vweird.f32 %v229_v11 }
 0x1f4   :  { %v292_v21 = vor.u32 1.1754944e-38, %v291_v17  ;;  %vm290_vm9 = vcmp.eq.f32.partialorder %v289_v19, 8.507059e+37  ;;  %v38_v17 = vld [vmem:[%s1550_s2 + $0x38] sm:$0xff] }
 0x1f8   :  { %v1124_v13 = vpop.eup %1123 }
 0x1f9   :  { %v281_v15 = vmul.f32 %v1124_v13, %v229_v11  ;;  %vm286_vm6 = vweird.f32 %v1124_v13 }
 0x1fa   :  { %vm287_vm8 = vmor %vm285_vm7, %vm286_vm6 }
 0x1fb   :  { %v282_v16 = vsub.f32 1.0, %v281_v15 }
 0x1fd   :  { %v283_v18 = vmul.f32 %v1124_v13, %v282_v16 }
 0x1ff   :  { %v284_v20 = vadd.f32 %v1124_v13, %v283_v18 }
 0x201   :  { %v288_v22 = vsel %vm287_vm8, %v1124_v13, %v284_v20 }
 0x202   :  { %v277_v23 = vpop.f32.mrf.mxu3  ;;  %v293_v24 = vsel %vm290_vm9, %v292_v21, %v288_v22 }
 0x203   :  { %v294_v25 = vmul.f32 %v293_v24, %v277_v23 }
 0x204   :  { %v530_v26 = vpop.f32.mrf.mxu0 }
 0x205   :  { %v533_v27 = vmul.f32 0.35355338, %v530_v26  ;;  %992 = vmatmul.msk.f32.vlgmr.msra.gmra.mxu3 %vm171_vm1, %v294_v25 }
 0x207   :  { %v534_v29 = vadd.f32 %v533_v27, %v1398_v12 }
 0x208   :  { %540 = vrot.lane.b32.xlu1 %v1287_v28, %s1174_s11 }
 0x209   :  { %v535_v30 = vmul.f32 1.442695, %v534_v29 }
 0x20b   :  { %1125 = vpow2.f32 %v535_v30 }
 0x210   :  { %1091 = vrot.lane.b32.xlu1 %v1312_v39, %s1176_s16 }
 0x211   :  { %v1126_v31 = vpop.eup %1125 }
 0x212   :  { %v537_v32 = vsel %vm226_vm5, %v1126_v31, 0.0 }
 0x213   :  { %538 = vadd.xlane.f32.xlu2 %v537_v32 }
 0x218   :  { %1096 = vrot.lane.b32.xlu1 %v1294_v36, %s1176_s16  ;;  %v37_v36 = vld [vmem:[%s1550_s2 + $0x30] sm:$0xff] }
 0x219   :  { %623 = vmatpush.msrb.mxu3 %v37_v36 }
 0x220   :  { %1101 = vrot.lane.b32.xlu1 %v1310_v38, %s1176_s16 }
 0x228   :  { %1106 = vrot.lane.b32.xlu1 %v1332_v43, %s1176_s16 }
 0x22b   :  { %696 = vrot.lane.b32.xlu2 %v1287_v28, %s1176_s16 }
 0x23c   :  { %v686_v33 = vpop.f32.mrf.mxu1 }
 0x23d   :  { %v689_v34 = vmul.f32 0.35355338, %v686_v33 }
 0x23f   :  { %v690_v35 = vadd.f32 %v689_v34, %v1398_v12 }
 0x241   :  { %v691_v37 = vmul.f32 1.442695, %v690_v35 }
 0x243   :  { %1127 = vpow2.f32 %v691_v37  ;;  %v1112_v37 = vld [vmem:[%s1550_s2 + $0x88] ss:$0 sm:$0xff] }
 0x249   :  { %v1445_v40 = vpop.eup %1127 }
 0x24a   :  { %v693_v39 = vsel %vm226_vm5, %v1445_v40, 0.0 }
 0x24b   :  { %694 = vadd.xlane.f32.xlu0 %v693_v39 }
 0x262   :  { %v361_v41 = vpop.xlane.xlu1 %360 }
 0x263   :  { %1129 = vrcp.f32 %v361_v41  ;;  %v423_v42 = vand.u32 2147483648, %v361_v41  ;;  %v421_v44 = vand.u32 2147483647, %v361_v41  ;;  %vm417_vm11 = vweird.f32 %v361_v41 }
 0x265   :  { %v424_v46 = vor.u32 1.1754944e-38, %v423_v42  ;;  %vm422_vm13 = vcmp.eq.f32.partialorder %v421_v44, 8.507059e+37 }
 0x269   :  { %v1130_v28 = vpop.eup %1129 }
 0x26a   :  { %v413_v38 = vmul.f32 %v1130_v28, %v361_v41  ;;  %vm418_vm10 = vweird.f32 %v1130_v28 }
 0x26b   :  { %vm419_vm12 = vmor %vm417_vm11, %vm418_vm10  ;;  %vm847_vm11 = vcmask 523264  }
 0x26c   :  { %v414_v43 = vsub.f32 1.0, %v413_v38  ;;  %v1177_v38 = vmov 32.0  }
 0x26e   :  { %v415_v12 = vmul.f32 %v1130_v28, %v414_v43 }
 0x270   :  { %v416_v45 = vadd.f32 %v1130_v28, %v415_v12 }
 0x271   :  { %v409_v48 = vpop.f32.mrf.mxu3 }
 0x272   :  { %v420_v47 = vsel %vm419_vm12, %v1130_v28, %v416_v45 }
 0x273   :  { %v425_v49 = vsel %vm422_vm13, %v424_v46, %v420_v47 }
 0x274   :  { %v426_v50 = vmul.f32 %v425_v49, %v409_v48 }
 0x276   :  { %991 = vmatmul.msk.f32.vlgmr.msrb.gmra.mxu2 %vm171_vm1, %v426_v50 }
 0x27a   :  { %v541_v51 = vpop.permute.xlu1 %540 }
 0x27b   :  { %585 = vmatpush.msra.mxu2 %v541_v51  ;;  %v61_v51 = vld [vmem:[%s1551_s3 + $0x38] sm:$0xff] }
 0x27d   :  { %779 = vmatpush.msrb.mxu2 %v38_v17 }
 0x27e   :  { %1003 = vmatmul.msk.f32.vlgmr.msra.gmra.mxu2 %vm226_vm5, %v1126_v31 }
 0x27f   :  { %837 = vmatpush.msra.mxu2 %v61_v51 }
 0x282   :  { %v1092_v52 = vpop.permute.xlu1 %1091 }
 0x283   :  { %v1093_v53 = vunpack.i.l.bf16 %v1092_v52  ;;  %v1094_v54 = vunpack.i.h.bf16 %v1092_v52  ;;  %v60_v52 = vld [vmem:[%s1551_s3 + $0x30] sm:$0xff] }
 0x284   :  { %838 = vmatpush.msra.mxu2 %v60_v52 }
 0x285   :  { %733 = vmatpush.msra.mxu3 %v1093_v53  ;;  %v59_v53 = vld [vmem:[%s1551_s3 + $0x28] sm:$0xff] }
 0x286   :  { %v539_v61 = vpop.xlane.xlu2 %538  ;;  %839 = vmatpush.msra.mxu2 %v59_v53 }
 0x287   :  { %734 = vmatpush.msra.mxu3 %v1094_v54  ;;  %1131 = vrcp.f32 %v539_v61  ;;  %v601_v8 = vand.u32 2147483648, %v539_v61  ;;  %vm595_vm15 = vweird.f32 %v539_v61  ;;  %v599_v9 = vand.u32 2147483647, %v539_v61  ;;  %v58_v54 = vld [vmem:[%s1551_s3 + $0x20] sm:$0xff] }
 0x288   :  { %v470_v21 = vpop.f32.mrf.mxu3  ;;  %840 = vmatpush.msra.mxu2 %v58_v54 }
 0x289   :  { %v602_v11 = vor.u32 1.1754944e-38, %v601_v8  ;;  %vm600_vm3 = vcmp.eq.f32.partialorder %v599_v9, 8.507059e+37  ;;  %v1114_v8 = vld [vmem:[%s1550_s2 + $0xa0] ss:$0 sm:$0xff] }
 0x28a   :  { %v1097_v55 = vpop.permute.xlu1 %1096 }
 0x28b   :  { %v1098_v56 = vunpack.i.l.bf16 %v1097_v55  ;;  %v1099_v57 = vunpack.i.h.bf16 %v1097_v55  ;;  %v46_v55 = vld [vmem:[%s1550_s2 + $0x78] sm:$0xff] }
 0x28d   :  { %735 = vmatpush.msra.mxu3 %v1098_v56  ;;  %v1132_v2 = vpop.eup %1131  ;;  %v45_v56 = vld [vmem:[%s1550_s2 + $0x70] sm:$0xff] }
 0x28e   :  { %v697_v1 = vpop.permute.xlu2 %696  ;;  %v591_v3 = vmul.f32 %v1132_v2, %v539_v61  ;;  %vm596_vm14 = vweird.f32 %v1132_v2 }
 0x28f   :  { %736 = vmatpush.msra.mxu3 %v1099_v57  ;;  %vm597_vm2 = vmor %vm595_vm15, %vm596_vm14  ;;  %v44_v57 = vld [vmem:[%s1550_s2 + $0x68] sm:$0xff]  ;;  %vm926_vm15 = vcmask 130048  }
 0x290   :  { %v592_v4 = vsub.f32 1.0, %v591_v3 }
 0x292   :  { %v1102_v58 = vpop.permute.xlu1 %1101  ;;  %v593_v5 = vmul.f32 %v1132_v2, %v592_v4 }
 0x293   :  { %v1103_v59 = vunpack.i.l.bf16 %v1102_v58  ;;  %v1104_v60 = vunpack.i.h.bf16 %v1102_v58 }
 0x294   :  { %v594_v7 = vadd.f32 %v1132_v2, %v593_v5  ;;  %v1113_v5 = vld [vmem:[%s1550_s2 + $0x98] ss:$0 sm:$0xff] }
 0x295   :  { %737 = vmatpush.msra.mxu3 %v1103_v59 }
 0x296   :  { %v598_v10 = vsel %vm597_vm2, %v1132_v2, %v594_v7 }
 0x297   :  { %738 = vmatpush.msra.mxu3 %v1104_v60  ;;  %v603_v15 = vsel %vm600_vm3, %v602_v11, %v598_v10  ;;  %v43_v60 = vld [vmem:[%s1550_s2 + $0x60] sm:$0xff]  ;;  %v41_v11 = vld [vmem:[%s1550_s2 + $0x50] sm:$0xff] }
 0x29a   :  { %v1107_v62 = vpop.permute.xlu1 %1106 }
 0x29b   :  { %v1108_v63 = vunpack.i.l.bf16 %v1107_v62  ;;  %v1109_v0 = vunpack.i.h.bf16 %v1107_v62  ;;  %v42_v62 = vld [vmem:[%s1550_s2 + $0x58] sm:$0xff] }
 0x29d   :  { %739 = vmatpush.msra.mxu3 %v1108_v63 }
 0x29f   :  { %740 = vmatpush.msra.mxu3 %v1109_v0 }
 0x2a1   :  { %741 = vmatpush.msra.mxu3 %v697_v1 }
 0x2be   :  { %v695_v18 = vpop.xlane.xlu0 %694 }
 0x2bf   :  { %1133 = vrcp.f32 %v695_v18  ;;  %v757_v29 = vand.u32 2147483648, %v695_v18  ;;  %vm751_vm6 = vweird.f32 %v695_v18  ;;  %v755_v30 = vand.u32 2147483647, %v695_v18 }
 0x2c0   :  { %1135 = vrcp.f32 %v1177_v38 }
 0x2c1   :  { %v758_v32 = vor.u32 1.1754944e-38, %v757_v29  ;;  %vm756_vm7 = vcmp.eq.f32.partialorder %v755_v30, 8.507059e+37 }
 0x2c5   :  { %v1134_v19 = vpop.eup %1133 }
 0x2c6   :  { %v747_v20 = vmul.f32 %v1134_v19, %v695_v18  ;;  %vm752_vm4 = vweird.f32 %v1134_v19  ;;  %v1136_v43 = vpop.eup %1135 }
 0x2c7   :  { %v792_v42 = vmul.f32 32.0, %v1136_v43 }
 0x2c8   :  { %v748_v22 = vsub.f32 1.0, %v747_v20  ;;  %v1116_v20 = vld [vmem:[%s1550_s2 + $0x90] ss:$0 sm:$0xff] }
 0x2c9   :  { %v793_v12 = vsub.f32 1.0, %v792_v42  ;;  %v1117_v42 = vld [vmem:[%s1550_s2 + $0xa8] ss:$0 sm:$0xff] }
 0x2ca   :  { %v749_v23 = vmul.f32 %v1134_v19, %v748_v22 }
 0x2cb   :  { %v794_v44 = vmul.f32 %v1136_v43, %v793_v12 }
 0x2cc   :  { %v750_v27 = vadd.f32 %v1134_v19, %v749_v23 }
 0x2cd   :  { %v795_v45 = vadd.f32 %v1136_v43, %v794_v44 }
 0x2f9   :  { %v447_v6 = vpop.f32.mrf.mxu2 }
 0x2fa   :  { %v471_v24 = vadd.f32 %v470_v21, %v447_v6 }
 0x301   :  { %v587_v13 = vpop.f32.mrf.mxu2 }
 0x302   :  { %v604_v16 = vmul.f32 %v603_v15, %v587_v13  ;;  %v40_v13 = vld [vmem:[%s1550_s2 + $0x48] sm:$0xff]  ;;  %v39_v15 = vld [vmem:[%s1550_s2 + $0x40] sm:$0xff] }
 0x304   :  { %1004 = vmatmul.msk.f32.vlgmr.msrb.gmra.mxu3 %vm171_vm1, %v604_v16  ;;  %v1115_v16 = vld [vmem:[%s1551_s3 + $0x48] ss:$0 sm:$0xff] }
 0x305   :  { %859 = vmatpush.msrb.mxu3 %v46_v55 }
 0x307   :  { %860 = vmatpush.msrb.mxu3 %v45_v56 }
 0x309   :  { %861 = vmatpush.msrb.mxu3 %v44_v57 }
 0x30b   :  { %862 = vmatpush.msrb.mxu3 %v43_v60 }
 0x30c   :  { %1015 = vmatmul.msk.f32.vlgmr.msra.gmra.mxu3 %vm226_vm5, %v1445_v40  ;;  %vm753_vm5 = vmor %vm751_vm6, %vm752_vm4 }
 0x30d   :  { %v754_v31 = vsel %vm753_vm5, %v1134_v19, %v750_v27  ;;  %863 = vmatpush.msrb.mxu3 %v42_v62 }
 0x30e   :  { %v759_v34 = vsel %vm756_vm7, %v758_v32, %v754_v31  ;;  %v901_v31 = vld [vmem:[%s1552_s4 + $0x18] sm:$0xff]  ;;  %v900_v32 = vld [vmem:[%s1552_s4 + $0x10] sm:$0xff] }
 0x30f   :  { %864 = vmatpush.msrb.mxu3 %v41_v11 }
 0x311   :  { %865 = vmatpush.msrb.mxu3 %v40_v13 }
 0x313   :  { %866 = vmatpush.msrb.mxu3 %v39_v15 }
 0x387   :  { %v625_v25 = vpop.f32.mrf.mxu3 }
 0x388   :  { %v628_v26 = vadd.f32 %v625_v25, %v471_v24 }
 0x38f   :  { %v743_v33 = vpop.f32.mrf.mxu3 }
 0x390   :  { %v760_v35 = vmul.f32 %v759_v34, %v743_v33  ;;  %v899_v33 = vld [vmem:[%s1552_s4 + $0x8] sm:$0xff]  ;;  %v898_v34 = vld [vmem:[%s1552_s4] sm:$0xff] }
 0x392   :  { %1016 = vmatmul.msk.f32.vlgmr.msrb.gmra.mxu2 %vm171_vm1, %v760_v35  ;;  %vm796_vm1 = vweird.f32 %v1136_v43 }
 0x393   :  { %v1466_v46 = vsel %vm796_vm1, %v1136_v43, %v795_v45  ;;  %917 = vmatpush.msrb.mxu2 %v901_v31  ;;  %v1118_v45 = vld [vmem:[%s1550_s2 + $0xb0] ss:$0 sm:$0xff]  ;;  %s1178_s2 = smov [#allocation2]  }
 0x394   :  { %s948_s11 = sshll.u32 %s1178_s2, 4  ;;  %s949_s11 = int_to_ptr.vmem [resolvable:$true] %s948_s11 }
 0x395   :  { %918 = vmatpush.msrb.mxu2 %v900_v32 }
 0x397   :  { %919 = vmatpush.msrb.mxu2 %v899_v33 }
 0x399   :  { %920 = vmatpush.msrb.mxu2 %v898_v34 }
 0x415   :  { %v781_v40 = vpop.f32.mrf.mxu2 }
 0x416   :  { %v784_v39 = vadd.f32 %v781_v40, %v628_v26 }
 0x418   :  { %v786_v41 = vadd.f32 %v1112_v37, %v784_v39 }
 0x41a   :  { %v787_v36 = vadd.f32 %v786_v41, %v1259_v14 }
 0x41c   :  { %v788_v28 = vsel %vm65_vm0, %v787_v36, 0.0 }
 0x41d   :  { %789 = vadd.xlane.f32.xlu1 %v788_v28 }
 0x490   :  { %v790_v47 = vpop.xlane.xlu1 %789 }
 0x491   :  { %v798_v48 = vmul.f32 %v1466_v46, %v790_v47 }
 0x493   :  { %v799_v49 = vsub.f32 %v787_v36, %v798_v48 }
 0x495   :  { %v800_v50 = vmul.f32 %v799_v49, %v799_v49 }
 0x497   :  { %v801_v14 = vsel %vm65_vm0, %v800_v50, 0.0 }
 0x498   :  { %802 = vadd.xlane.f32.xlu0 %v801_v14 }
 0x50b   :  { %v803_v58 = vpop.xlane.xlu0 %802 }
 0x50c   :  { %v804_v59 = vmul.f32 %v803_v58, %v1466_v46 }
 0x50e   :  { %v805_v61 = vadd.f32 1e-05, %v804_v59 }
 0x510   :  { %1137 = vrsqrt.f32 %v805_v61  ;;  %vm812_vm9 = vweird.f32 %v805_v61 }
 0x516   :  { %v1138_v63 = vpop.eup %1137 }
 0x517   :  { %v807_v0 = vmul.f32 %v1138_v63, %v805_v61  ;;  %vm813_vm8 = vweird.f32 %v1138_v63 }
 0x518   :  { %vm814_vm10 = vmor %vm812_vm9, %vm813_vm8 }
 0x519   :  { %v808_v1 = vmul.f32 %v1138_v63, %v807_v0 }
 0x51b   :  { %v809_v2 = vmul.f32 0.5, %v808_v1 }
 0x51d   :  { %v810_v3 = vsub.f32 1.5, %v809_v2 }
 0x51f   :  { %v811_v4 = vmul.f32 %v1138_v63, %v810_v3 }
 0x521   :  { %v815_v6 = vsel %vm814_vm10, %v1138_v63, %v811_v4 }
 0x522   :  { %v816_v7 = vmul.f32 %v815_v6, %v799_v49 }
 0x524   :  { %v818_v9 = vmul.f32 %v1113_v5, %v816_v7 }
 0x526   :  { %v820_v10 = vadd.f32 %v1114_v8, %v818_v9 }
 0x528   :  { %1017 = vmatmul.msk.f32.vlgmr.msra.gmra.mxu2 %vm65_vm0, %v820_v10 }
 0x5ab   :  { %v842_v17 = vpop.f32.mrf.mxu2 }
 0x5ac   :  { %v843_v18 = vadd.f32 %v1115_v16, %v842_v17 }
 0x5ae   :  { %v845_v19 = vmax.f32 %v843_v18, 0.0 }
 0x5b0   :  { %1018 = vmatmul.msk.f32.vlgmr.msrb.gmra.mxu3 %vm847_vm11, %v845_v19 }
 0x633   :  { %v868_v21 = vpop.f32.mrf.mxu3 }
 0x634   :  { %v869_v22 = vadd.f32 %v1116_v20, %v868_v21 }
 0x636   :  { %v871_v23 = vadd.f32 %v869_v22, %v820_v10 }
 0x638   :  { %v872_v24 = vsel %vm65_vm0, %v871_v23, 0.0 }
 0x639   :  { %873 = vadd.xlane.f32.xlu0 %v872_v24 }
 0x6ac   :  { %v874_v25 = vpop.xlane.xlu0 %873 }
 0x6ad   :  { %v875_v26 = vmul.f32 %v874_v25, %v1466_v46 }
 0x6af   :  { %v876_v27 = vsub.f32 %v871_v23, %v875_v26 }
 0x6b1   :  { %v877_v29 = vmul.f32 %v876_v27, %v876_v27 }
 0x6b3   :  { %v878_v30 = vsel %vm65_vm0, %v877_v29, 0.0 }
 0x6b4   :  { %879 = vadd.xlane.f32.xlu2 %v878_v30 }
 0x727   :  { %v880_v35 = vpop.xlane.xlu2 %879 }
 0x728   :  { %v881_v37 = vmul.f32 %v880_v35, %v1466_v46 }
 0x72a   :  { %v882_v40 = vadd.f32 1e-05, %v881_v37 }
 0x72c   :  { %1139 = vrsqrt.f32 %v882_v40  ;;  %vm889_vm13 = vweird.f32 %v882_v40 }
 0x732   :  { %v1140_v39 = vpop.eup %1139 }
 0x733   :  { %v884_v41 = vmul.f32 %v1140_v39, %v882_v40  ;;  %vm890_vm12 = vweird.f32 %v1140_v39 }
 0x734   :  { %vm891_vm14 = vmor %vm889_vm13, %vm890_vm12 }
 0x735   :  { %v885_v36 = vmul.f32 %v1140_v39, %v884_v41 }
 0x737   :  { %v886_v28 = vmul.f32 0.5, %v885_v36 }
 0x739   :  { %v887_v38 = vsub.f32 1.5, %v886_v28 }
 0x73b   :  { %v888_v43 = vmul.f32 %v1140_v39, %v887_v38 }
 0x73d   :  { %v892_v12 = vsel %vm891_vm14, %v1140_v39, %v888_v43 }
 0x73e   :  { %v893_v44 = vmul.f32 %v892_v12, %v876_v27 }
 0x740   :  { %v895_v46 = vmul.f32 %v1117_v42, %v893_v44 }
 0x742   :  { %v897_v47 = vadd.f32 %v1118_v45, %v895_v46 }
 0x744   :  { %1019 = vmatmul.msk.f32.vlgmr.msrb.gmra.mxu2 %vm65_vm0, %v897_v47 }
 0x7c7   :  { %v922_v48 = vpop.f32.mrf.mxu2 }
 0x7c8   :  { %v925_v49 = vmul.f32 %v922_v48, %v922_v48 }
 0x7ca   :  { %v927_v50 = vsel %vm926_vm15, %v925_v49, 0.0 }
 0x7cb   :  { %928 = vadd.xlane.f32.xlu0 %v927_v50 }
 0x83e   :  { %v929_v14 = vpop.xlane.xlu0 %928 }
 0x83f   :  { %v930_v51 = vadd.f32 1e-12, %v929_v14 }
 0x841   :  { %1141 = vrsqrt.f32 %v930_v51  ;;  %vm937_vm3 = vweird.f32 %v930_v51 }
 0x847   :  { %v1142_v52 = vpop.eup %1141 }
 0x848   :  { %v932_v53 = vmul.f32 %v1142_v52, %v930_v51  ;;  %vm938_vm2 = vweird.f32 %v1142_v52 }
 0x849   :  { %vm939_vm0 = vmor %vm937_vm3, %vm938_vm2 }
 0x84a   :  { %v933_v54 = vmul.f32 %v1142_v52, %v932_v53 }
 0x84c   :  { %v934_v55 = vmul.f32 0.5, %v933_v54 }
 0x84e   :  { %v935_v56 = vsub.f32 1.5, %v934_v55 }
 0x850   :  { %v936_v57 = vmul.f32 %v1142_v52, %v935_v56 }
 0x852   :  { %v940_v58 = vsel %vm939_vm0, %v1142_v52, %v936_v57 }
 0x853   :  { %v941_v59 = vmul.f32 %v940_v58, %v922_v48 }
 0x855   :  { %942 = vst.msk [vmem:[#allocation2] sm:$0xff] %vm926_vm15, %v941_v59 }
 0x856   :  { %953 = dma.vmem_to_hbm [thread:$0]  %s949_s11, 128, %s951_s14, [#allocation3]  }
 0x857   :  { %1167 = dma.done.wait [#allocation3], 128  }
 0x858   :  { %1168 = vsyncadd [#allocation3], 4294967168 }
 0x859   :  { %958 = vsyncpa [#allocation3], 1 }

</bundles_post_ra>
